<compile_context>
chip_gen: v7x
topology: tpu7x:2x2x1
jax: 0.10.0
libtpu: 0.0.40
codegen_flags: <defaults>
</compile_context>

<pallas_src>
import jax
import jax.numpy as jnp
from jax.experimental import pallas as pl
from jax.experimental.pallas import tpu as pltpu


def _mlp_kernel(x_ref, w_ref, b_ref, o_ref):
    # x_ref: (C, TN)   activation block, tokens on the lane axis
    # w_ref: (D, C)    full weight (torch nn.Linear layout), VMEM-resident
    # b_ref: (D, 1)    bias, broadcast along lanes
    # o_ref: (TN, D)   output block, already in (B, N, D) layout
    acc = jnp.dot(w_ref[...], x_ref[...],
                  preferred_element_type=jnp.float32)      # (D, TN) on the MXU
    acc = acc + b_ref[...]
    # XLU transpose (free slot, hidden under DMA); cast after the f32 transpose.
    o_ref[...] = acc.T.astype(o_ref.dtype)                  # (TN, D)


def segformer_mlp(hidden_states, weight, bias, *, tile_n=None):
    """SegformerMLP forward.

    hidden_states: (B, C, H, W)
    weight:        (D, C)   -- torch nn.Linear weight layout (out, in)
    bias:          (D,)
    returns:       (B, H*W, D)
    """
    B, C, H, W = hidden_states.shape
    D, C_w = weight.shape
    assert C_w == C
    N = H * W

    # Free, metadata-only reshape: NCHW -> (B, C, N). No transpose pass.
    x3 = hidden_states.reshape(B, C, N)

    if tile_n is None:
        # Big lane-dense token tiles, capped so double-buffered input/output
        # blocks stay well inside v7x's 64 MiB VMEM at production C/D sizes.
        tile_n = min(pl.cdiv(N, 128) * 128, 2048)

    grid = (B, pl.cdiv(N, tile_n))

    out = pl.pallas_call(
        _mlp_kernel,
        out_shape=jax.ShapeDtypeStruct((B, N, D), hidden_states.dtype),
        grid_spec=pltpu.PrefetchScalarGridSpec(
            num_scalar_prefetch=0,
            grid=grid,
            in_specs=[
                # Activation: the NCHW permutation is fused into the indexing.
                pl.BlockSpec((None, C, tile_n), lambda b, n: (b, 0, n)),
                # Weight / bias: constant index map -> fetched once, stays in VMEM.
                pl.BlockSpec((D, C), lambda b, n: (0, 0)),
                pl.BlockSpec((D, 1), lambda b, n: (0, 0)),
            ],
            # Direct (B, N, D) output: no wrapper-level transpose pass needed.
            out_specs=pl.BlockSpec((None, tile_n, D), lambda b, n: (b, n, 0)),
        ),
        compiler_params=pltpu.CompilerParams(
            dimension_semantics=("parallel", "parallel"),
            vmem_limit_bytes=48 * 1024 * 1024,  # headroom under v7x's 64 MiB
        ),
    )(x3, weight, bias.reshape(D, 1))

    return out


if __name__ == "__main__":
    # SegformerMLP(config.decoder_hidden_size=32, input_dim=4)
    B, C, H, W = 2, 4, 16, 16
    D = 32

    key = jax.random.PRNGKey(0)
    kx, kw, kb = jax.random.split(key, 3)

    x = jax.random.normal(kx, (B, C, H, W), dtype=jnp.float32)
    # nn.Linear(input_dim, decoder_hidden_size): weight (D, C), bias (D,)
    w = jax.random.normal(kw, (D, C), dtype=jnp.float32) * 0.1
    b = jax.random.normal(kb, (D,), dtype=jnp.float32) * 0.1

    fn = jax.jit(segformer_mlp)
    out = fn(x, w, b)
    jax.block_until_ready(out)

    # Reference: same math as PyTorch forward (flatten(2).transpose(1,2) @ W^T + b)
    ref = jnp.einsum("bcn,dc->bnd", x.reshape(B, C, H * W), w) + b
    assert out.shape == (B, H * W, D)
    assert jnp.allclose(out, ref, atol=1e-5, rtol=1e-5)

    print("KERNEL_OK")
</pallas_src>

<mosaic_0001>
module attributes {stable_mosaic.version = 11 : i64} {
  func.func @_mlp_kernel(%arg0: i32, %arg1: i32, %arg2: memref<1x4x256xf32, #tpu.memory_space<vmem>>, %arg3: memref<32x4xf32, #tpu.memory_space<vmem>>, %arg4: memref<32x1xf32, #tpu.memory_space<vmem>>, %arg5: memref<1x256x32xf32, #tpu.memory_space<vmem>>) attributes {dimension_semantics = [#tpu.dimension_semantics<parallel>, #tpu.dimension_semantics<parallel>], iteration_bounds = array<i64: 2, 1>, scalar_prefetch = 0 : i64, scratch_operands = 0 : i64, tpu.core_type = #tpu.core_type<tc>, window_params = [{transform_indices = @transform_0, window_bounds = array<i64: 1, 4, 256>}, {pipeline_mode = #tpu.pipeline_mode<synchronous>, transform_indices = @transform_1, window_bounds = array<i64: 32, 4>}, {pipeline_mode = #tpu.pipeline_mode<synchronous>, transform_indices = @transform_2, window_bounds = array<i64: 32, 1>}, {transform_indices = @transform_3, window_bounds = array<i64: 1, 256, 32>}]} {
    %c0 = arith.constant 0 : index
    %c0_0 = arith.constant 0 : index
    %0 = vector.load %arg3[%c0, %c0_0] : memref<32x4xf32, #tpu.memory_space<vmem>>, vector<32x4xf32>
    %c0_1 = arith.constant 0 : index
    %c0_2 = arith.constant 0 : index
    %c0_3 = arith.constant 0 : index
    %1 = vector.load %arg2[%c0_1, %c0_2, %c0_3] : memref<1x4x256xf32, #tpu.memory_space<vmem>>, vector<1x4x256xf32>
    %2 = vector.shape_cast %1 : vector<1x4x256xf32> to vector<4x256xf32>
    %cst = arith.constant dense<0.000000e+00> : vector<32x256xf32>
    %3 = tpu.matmul %0, %2, %cst {dimension_numbers = #tpu.dot_dimension_numbers<[1], [0], [0], [1], [0, 0, 1, 1], [], []>} : vector<32x4xf32>, vector<4x256xf32>, vector<32x256xf32> -> vector<32x256xf32>
    %c0_4 = arith.constant 0 : index
    %c0_5 = arith.constant 0 : index
    %4 = vector.load %arg4[%c0_4, %c0_5] : memref<32x1xf32, #tpu.memory_space<vmem>>, vector<32x1xf32>
    %5 = vector.broadcast %4 : vector<32x1xf32> to vector<32x256xf32>
    %6 = arith.addf %3, %5 : vector<32x256xf32>
    %7 = tpu.transpose %6, [1, 0] : vector<32x256xf32> -> vector<256x32xf32>
    %c0_6 = arith.constant 0 : index
    %c0_7 = arith.constant 0 : index
    %c0_8 = arith.constant 0 : index
    %8 = vector.load %arg5[%c0_6, %c0_7, %c0_8] : memref<1x256x32xf32, #tpu.memory_space<vmem>>, vector<1x256x32xf32>
    %9 = vector.shape_cast %8 : vector<1x256x32xf32> to vector<256x32xf32>
    %10 = vector.shape_cast %7 : vector<256x32xf32> to vector<1x256x32xf32>
    tpu.vector_store %arg5[%c0_6, %c0_7, %c0_8], %10 {strides = array<i32>} : memref<1x256x32xf32, #tpu.memory_space<vmem>>, vector<1x256x32xf32>,
    return
  }
  func.func @transform_0(%arg0: i32, %arg1: i32) -> (i32, i32, i32) {
    %c0_i32 = arith.constant 0 : i32
    %c0_i32_0 = arith.constant 0 : i32
    return %arg0, %c0_i32, %arg1 : i32, i32, i32
  }
  func.func @transform_1(%arg0: i32, %arg1: i32) -> (i32, i32) {
    %c0_i32 = arith.constant 0 : i32
    %c0_i32_0 = arith.constant 0 : i32
    %c0_i32_1 = arith.constant 0 : i32
    return %c0_i32, %c0_i32_0 : i32, i32
  }
  func.func @transform_2(%arg0: i32, %arg1: i32) -> (i32, i32) {
    %c0_i32 = arith.constant 0 : i32
    %c0_i32_0 = arith.constant 0 : i32
    %c0_i32_1 = arith.constant 0 : i32
    return %c0_i32, %c0_i32_0 : i32, i32
  }
  func.func @transform_3(%arg0: i32, %arg1: i32) -> (i32, i32, i32) {
    %c0_i32 = arith.constant 0 : i32
    %c0_i32_0 = arith.constant 0 : i32
    return %arg0, %arg1, %c0_i32 : i32, i32, i32
  }
}

</mosaic_0001>

<bundles_post_ra>
// kernel: segformer_mlp.1
= control target key start
LH: loop header
LB: loop body
LE: loop exit
PB: predicated region body
PF: predicated region fallthrough
CT: control target
= control target key end

     0   :  { %s628_s12 = smov 0   ;;  %s630_s13 = smov 0   ;;  %s755_s0 = inlined_call_operand.vmem [shape: f32[2,4,256], index: 0, kind: input, shape index: {}]   ;;  %s756_s1 = inlined_call_operand.vmem [shape: f32[32,4], index: 1, kind: input, shape index: {}]   ;;  %s757_s2 = inlined_call_operand.vmem [shape: f32[32,1], index: 2, kind: input, shape index: {}]   ;;  %s758_s3 = inlined_call_operand.vmem [shape: f32[2,256,32], index: 3, kind: output, shape index: {}]  }
   0x1   :  { %s632_s14 = smov 0  }
   0x2 LB: > { %s25_s15 = sadd.s32 1, %s600_s13  ;;  %p536_p0 = scmp.ge.s32.totalorder %s604_s14, 1  ;;  %s604_s14 = sphi %s632_s14, %s13_s14   ;;  %s600_s13 = sphi %s630_s13, %s760_s13   ;;  %s596_s12 = sphi %s628_s12, %s759_s12  }
   0x3   : > { %p27_p1 = scmp.ge.s32.totalorder %s25_s15, 2  ;;  %p158_p2 = scmp.lt.s32.totalorder %s604_s14, 3 }
   0x5   : > { %s762_s15 = smov (%p27_p1, %s25_s15), 0  ;;  %p159_p3 = pnand %p536_p0, %p158_p2 }
   0x6   : > { %p191_p4 = scmp.lt.s32.totalorder (!%p159_p3), %s596_s12, 1  ;;  %v606_v0 = vmov (!%p159_p3), 0.0   ;;  %v215_v1 = vld [vmem:[%s757_s2] sm:$0xff] (!%p159_p3)  ;;  %v607_v2 = vmov (!%p159_p3), 0   ;;  %v217_v3 = vld [vmem:[%s757_s2 + $0x10] sm:$0xff] (!%p159_p3)  ;;  %v216_v4 = vld [vmem:[%s757_s2 + $0x8] sm:$0xff] (!%p159_p3) }
   0x7   : > { %162 = sbr.rel (%p159_p3) target bundleno = 427 (0x1ab), region = 32  ;;  %323 = vmatprep.mubr.f32.mxu0 (!%p159_p3), %v606_v0  ;;  %335 = vmatprep.mubr.f32.mxu1 (!%p159_p3), %v606_v0  ;;  %v218_v5 = vld [vmem:[%s757_s2 + $0x18] sm:$0xff] (!%p159_p3)  ;;  %vm254_vm0 = vcmask (!%p159_p3), 1043456   ;;  %v210_v8 = vld [vmem:[%s756_s1] sm:$0xff] (!%p159_p3)  ;;  %vm241_vm1 = vcmask (!%p159_p3), 31744   ;;  %v212_v9 = vld [vmem:[%s756_s1 + $0x10] sm:$0xff] (!%p159_p3) }
   0x8   : > { %579 = vset.pattern.permute.xlu0 (!%p159_p3), %v607_v2  ;;  %580 = vset.pattern.permute.xlu1 (!%p159_p3), %v607_v2  ;;  %v211_v10 = vld [vmem:[%s756_s1 + $0x8] sm:$0xff] (!%p159_p3)  ;;  %v213_v11 = vld [vmem:[%s756_s1 + $0x18] sm:$0xff] (!%p159_p3)  ;;  %vm412_vm2 = vcmask (!%p159_p3), 261120  }
   0x9   : > { %221 = vperm.xlu0 (!%p159_p3), %579, %v215_v1   ;;  %231 = vperm.xlu1 (!%p159_p3), %580, %v217_v3  }
   0xd   : > { %226 = vperm.xlu0 (!%p159_p3), %579, %v216_v4   ;;  %236 = vperm.xlu1 (!%p159_p3), %580, %v218_v5  }
   0xe   : > { %s764_s12 = smov (!%p191_p4, %s596_s12), 1 }
   0xf   : > { %s549_s20 = sshll.u32 %s764_s12, 3  ;;  %s550_s9 = sshll.u32 %s764_s12, 8 }
  0x10   : > { %s198_s27 = scalar_lea.vmem %s755_s0, %s549_s20  ;;  %s680_s16 = scalar_lea.vmem %s758_s3, %s550_s9 }
  0x11   : > { %v214_v6 = vld [vmem:[%s198_s27] sm:$0xff] }
  0x12   : > { %v240_v7 = vcombine.high %v214_v6, %v214_v6 }
  0x14   : > { %541 = vmatprep.subr.msk.mxu0 %vm254_vm0, %v240_v7  ;;  %551 = vmatprep.subr.msk.mxu1 %vm254_vm0, %v240_v7 }
  0x15   : > { %542 = vmatpush1.msk.msra.mxu0 %vm254_vm0, %v214_v6  ;;  %552 = vmatpush1.msk.msra.mxu1 %vm254_vm0, %v214_v6 }
  0x16   : > { %543 = vmatmul.mubr.msk.f32.vlgmr.msra.gmra.mrb[0].mxu0 %vm241_vm1, %v210_v8  ;;  %545 = vmatmul.mubr.msk.f32.vlgmr.msra.gmra.mrb[0].mxu1 %vm241_vm1, %v212_v9 }
  0x17   : > { %329 = vmatprep.mubr.f32.mxu0 %v606_v0  ;;  %341 = vmatprep.mubr.f32.mxu1 %v606_v0 }
  0x1a   : > { %544 = vmatmul.mubr.msk.f32.gmra.mrb[2].mxu0 %vm241_vm1, %v211_v10  ;;  %546 = vmatmul.mubr.msk.f32.gmra.mrb[2].mxu1 %vm241_vm1, %v213_v11 }
  0x88   : > { %v222_v12 = vpop.permute.xlu0 %221  ;;  %v232_v20 = vpop.permute.xlu1 %231 }
  0x8c   : > { %v227_v19 = vpop.permute.xlu0 %226  ;;  %v237_v29 = vpop.permute.xlu1 %236 }
  0xe9   : > { %v325_v13 = vpop.f32.mrb[0].mxu0  ;;  %v337_v14 = vpop.f32.mrb[0].mxu1 }
  0xea   : > { %v326_v15 = vadd.f32 %v325_v13, %v222_v12  ;;  %v327_v16 = vpop.f32.mrb[1].mxu0  ;;  %v339_v17 = vpop.f32.mrb[1].mxu1  ;;  %v338_v27 = vadd.f32 %v337_v14, %v232_v20 }
  0xeb   : > { %v328_v18 = vadd.f32 %v327_v16, %v222_v12  ;;  %v340_v28 = vadd.f32 %v339_v17, %v232_v20 }
  0xec   : > { %348 = vxpose.xlu0.b32.start [1/4] (short) %v326_v15, 128 }
  0xed   : > { %v331_v21 = vpop.f32.mrb[2].mxu0  ;;  %380 = vxpose.xlu1.b32.start [1/4] (short) %v328_v18, 128  ;;  %v343_v22 = vpop.f32.mrb[2].mxu1 }
  0xee   : > { %v332_v23 = vadd.f32 %v331_v21, %v227_v19  ;;  %v333_v24 = vpop.f32.mrb[3].mxu0  ;;  %v345_v25 = vpop.f32.mrb[3].mxu1  ;;  %v344_v30 = vadd.f32 %v343_v22, %v237_v29 }
  0xef   : > { %v334_v26 = vadd.f32 %v333_v24, %v227_v19  ;;  %v346_v31 = vadd.f32 %v345_v25, %v237_v29 }
  0xf0   : > { %349 = vxpose.xlu0.b32.cont [2/4] (short) %v332_v23, 128 }
  0xf1   : > { %381 = vxpose.xlu1.b32.cont [2/4] (short) %v334_v26, 128 }
  0xf4   : > { %350 = vxpose.xlu0.b32.cont [3/4] (short) %v338_v27, 128 }
  0xf5   : > { %382 = vxpose.xlu1.b32.cont [3/4] (short) %v340_v28, 128 }
  0xf8   : > { %351 = vxpose.xlu0.b32.end [4/4] (short) %v344_v30, 128 }
  0xf9   : > { %383 = vxpose.xlu1.b32.end [4/4] (short) %v346_v31, 128 }
 0x16c   : > { %v364_v32 = vpop.trf.xlu0 }
 0x16d   : > { %v396_v33 = vpop.trf.xlu1  ;;  %413 = vst.msk [vmem:[%s680_s16] sm:$0xff] %vm412_vm2, %v364_v32 }
 0x16e   : > { %429 = vst.msk [vmem:[%s680_s16 + $0x80] sm:$0xff] %vm412_vm2, %v396_v33 }
 0x170   : > { %v365_v34 = vpop.trf.xlu0 }
 0x171   : > { %v397_v35 = vpop.trf.xlu1  ;;  %414 = vst.msk [vmem:[%s680_s16 + $0x8] sm:$0xff] %vm412_vm2, %v365_v34 }
 0x172   : > { %430 = vst.msk [vmem:[%s680_s16 + $0x88] sm:$0xff] %vm412_vm2, %v397_v35 }
 0x174   : > { %v366_v36 = vpop.trf.xlu0 }
 0x175   : > { %v398_v37 = vpop.trf.xlu1  ;;  %415 = vst.msk [vmem:[%s680_s16 + $0x10] sm:$0xff] %vm412_vm2, %v366_v36 }
 0x176   : > { %431 = vst.msk [vmem:[%s680_s16 + $0x90] sm:$0xff] %vm412_vm2, %v398_v37 }
 0x178   : > { %v367_v38 = vpop.trf.xlu0 }
 0x179   : > { %v399_v39 = vpop.trf.xlu1  ;;  %416 = vst.msk [vmem:[%s680_s16 + $0x18] sm:$0xff] %vm412_vm2, %v367_v38 }
 0x17a   : > { %432 = vst.msk [vmem:[%s680_s16 + $0x98] sm:$0xff] %vm412_vm2, %v399_v39 }
 0x17c   : > { %v368_v40 = vpop.trf.xlu0 }
 0x17d   : > { %v400_v41 = vpop.trf.xlu1  ;;  %417 = vst.msk [vmem:[%s680_s16 + $0x20] sm:$0xff] %vm412_vm2, %v368_v40 }
 0x17e   : > { %433 = vst.msk [vmem:[%s680_s16 + $0xa0] sm:$0xff] %vm412_vm2, %v400_v41 }
 0x180   : > { %v369_v42 = vpop.trf.xlu0 }
 0x181   : > { %v401_v43 = vpop.trf.xlu1  ;;  %418 = vst.msk [vmem:[%s680_s16 + $0x28] sm:$0xff] %vm412_vm2, %v369_v42 }
 0x182   : > { %434 = vst.msk [vmem:[%s680_s16 + $0xa8] sm:$0xff] %vm412_vm2, %v401_v43 }
 0x184   : > { %v370_v44 = vpop.trf.xlu0 }
 0x185   : > { %v402_v45 = vpop.trf.xlu1  ;;  %419 = vst.msk [vmem:[%s680_s16 + $0x30] sm:$0xff] %vm412_vm2, %v370_v44 }
 0x186   : > { %435 = vst.msk [vmem:[%s680_s16 + $0xb0] sm:$0xff] %vm412_vm2, %v402_v45 }
 0x188   : > { %v371_v46 = vpop.trf.xlu0 }
 0x189   : > { %v403_v47 = vpop.trf.xlu1  ;;  %420 = vst.msk [vmem:[%s680_s16 + $0x38] sm:$0xff] %vm412_vm2, %v371_v46 }
 0x18a   : > { %436 = vst.msk [vmem:[%s680_s16 + $0xb8] sm:$0xff] %vm412_vm2, %v403_v47 }
 0x18c   : > { %v372_v48 = vpop.trf.xlu0 }
 0x18d   : > { %v404_v49 = vpop.trf.xlu1  ;;  %421 = vst.msk [vmem:[%s680_s16 + $0x40] sm:$0xff] %vm412_vm2, %v372_v48 }
 0x18e   : > { %437 = vst.msk [vmem:[%s680_s16 + $0xc0] sm:$0xff] %vm412_vm2, %v404_v49 }
 0x190   : > { %v373_v50 = vpop.trf.xlu0 }
 0x191   : > { %v405_v51 = vpop.trf.xlu1  ;;  %422 = vst.msk [vmem:[%s680_s16 + $0x48] sm:$0xff] %vm412_vm2, %v373_v50 }
 0x192   : > { %438 = vst.msk [vmem:[%s680_s16 + $0xc8] sm:$0xff] %vm412_vm2, %v405_v51 }
 0x194   : > { %v374_v52 = vpop.trf.xlu0 }
 0x195   : > { %v406_v53 = vpop.trf.xlu1  ;;  %423 = vst.msk [vmem:[%s680_s16 + $0x50] sm:$0xff] %vm412_vm2, %v374_v52 }
 0x196   : > { %439 = vst.msk [vmem:[%s680_s16 + $0xd0] sm:$0xff] %vm412_vm2, %v406_v53 }
 0x198   : > { %v375_v54 = vpop.trf.xlu0 }
 0x199   : > { %v407_v55 = vpop.trf.xlu1  ;;  %424 = vst.msk [vmem:[%s680_s16 + $0x58] sm:$0xff] %vm412_vm2, %v375_v54 }
 0x19a   : > { %440 = vst.msk [vmem:[%s680_s16 + $0xd8] sm:$0xff] %vm412_vm2, %v407_v55 }
 0x19c   : > { %v376_v56 = vpop.trf.xlu0 }
 0x19d   : > { %v408_v57 = vpop.trf.xlu1  ;;  %425 = vst.msk [vmem:[%s680_s16 + $0x60] sm:$0xff] %vm412_vm2, %v376_v56 }
 0x19e   : > { %441 = vst.msk [vmem:[%s680_s16 + $0xe0] sm:$0xff] %vm412_vm2, %v408_v57 }
 0x1a0   : > { %v377_v58 = vpop.trf.xlu0 }
 0x1a1   : > { %v409_v59 = vpop.trf.xlu1  ;;  %426 = vst.msk [vmem:[%s680_s16 + $0x68] sm:$0xff] %vm412_vm2, %v377_v58 }
 0x1a2   : > { %442 = vst.msk [vmem:[%s680_s16 + $0xe8] sm:$0xff] %vm412_vm2, %v409_v59 }
 0x1a4   : > { %v378_v60 = vpop.trf.xlu0 }
 0x1a5   : > { %v410_v61 = vpop.trf.xlu1  ;;  %427 = vst.msk [vmem:[%s680_s16 + $0x70] sm:$0xff] %vm412_vm2, %v378_v60 }
 0x1a6   : > { %443 = vst.msk [vmem:[%s680_s16 + $0xf0] sm:$0xff] %vm412_vm2, %v410_v61 }
 0x1a8   : > { %v379_v62 = vpop.trf.xlu0 }
 0x1a9   : > { %v411_v63 = vpop.trf.xlu1  ;;  %428 = vst.msk [vmem:[%s680_s16 + $0x78] sm:$0xff] %vm412_vm2, %v379_v62 }
 0x1aa   : > { %444 = vst.msk [vmem:[%s680_s16 + $0xf8] sm:$0xff] %vm412_vm2, %v411_v63 }
 0x1ab PF: > { %s13_s14 = sadd.s32 1, %s604_s14   ;;  %s759_s12 = smov %s600_s13 }
 0x1ac   : > { %p10_p5 = scmp.ge.s32.totalorder %s13_s14, 4   ;;  %s760_s13 = smov %s762_s15 }
 0x1ae   :  { %12 = sbr.rel (!%p10_p5) target bundleno = 2 (0x2), region = 62 }

</bundles_post_ra>
